<compile_context>
chip_gen: v6e
topology: v6e:2x2x1
jax: 0.10.0
libtpu: 0.0.40
codegen_flags: <defaults>
</compile_context>

<pallas_src>
import functools

import jax
import jax.numpy as jnp
from jax.experimental import pallas as pl
from jax.experimental.pallas import tpu as pltpu


# --------------------------------------------------------------------------- #
# Kernel
# --------------------------------------------------------------------------- #
def _sobel_kernel(*refs, tiled_h, roll_w, roll_h, h_total):
    """Separable Sobel on one (n_img, TH, W) tile.

    refs = (x_ref, o_ref)                      when tiled_h is False
    refs = (x_ref, up_ref, dn_ref, o_ref)      when tiled_h is True
      up_ref / dn_ref are 8-row input blocks whose last / first row is the row
      directly above / below this tile (clamped at the image borders).
    """
    if tiled_h:
        x_ref, up_ref, dn_ref, o_ref = refs
    else:
        x_ref, o_ref = refs

    x = x_ref[...].astype(jnp.float32)
    # TODO(synk): keep bf16 intermediates on v6e/v7x to halve vreg/VMEM pressure.
    _, th, w = x.shape

    # ---- horizontal (lane axis) pass: d = right - left, s = left + 2c + right
    col = jax.lax.broadcasted_iota(jnp.int32, (1, 1, w), 2)
    col_first = col == 0
    col_last = col == (w - 1)

    def left(v):          # v[..., j-1], replicate-clamped at j == 0
        if roll_w:
            return jnp.where(col_first, v, pltpu.roll(v, 1, axis=2))
        return jnp.concatenate([v[:, :, :1], v[:, :, :-1]], axis=2)

    def right(v):         # v[..., j+1], replicate-clamped at j == W-1
        if roll_w:
            return jnp.where(col_last, v, pltpu.roll(v, w - 1, axis=2))
        return jnp.concatenate([v[:, :, 1:], v[:, :, -1:]], axis=2)

    def hpass(v):
        vl = left(v)
        vr = right(v)
        return vr - vl, vl + 2.0 * v + vr

    d, s = hpass(x)

    # d/s of the rows directly above / below this tile.  Only consumed at
    # interior tile boundaries; true image borders are overridden below.
    if tiled_h:
        d_top, s_top = hpass(up_ref[:, 7:8, :].astype(jnp.float32))
        d_bot, s_bot = hpass(dn_ref[:, 0:1, :].astype(jnp.float32))
    else:
        d_top, s_top = d[:, :1, :], s[:, :1, :]
        d_bot, s_bot = d[:, th - 1:th, :], s[:, th - 1:th, :]

    # ---- vertical (sublane axis) pass
    lrow = jax.lax.broadcasted_iota(jnp.int32, (1, th, 1), 1)
    lrow_first = lrow == 0
    lrow_last = lrow == (th - 1)
    grow = lrow + pl.program_id(1) * th          # global row index
    g_first = grow == 0                          # image top row   -> replicate
    g_last = grow == (h_total - 1)               # image bottom row-> replicate

    def shift_down(a, top_fill):                 # out[q] = a[q-1]; out[0] = top_fill
        if roll_h:
            return jnp.where(lrow_first, top_fill, pltpu.roll(a, 1, axis=1))
        return jnp.concatenate([top_fill, a[:, :-1, :]], axis=1)

    def shift_up(a, bot_fill):                   # out[q] = a[q+1]; out[-1] = bot_fill
        if roll_h:
            return jnp.where(lrow_last, bot_fill, pltpu.roll(a, th - 1, axis=1))
        return jnp.concatenate([a[:, 1:, :], bot_fill], axis=1)

    d_u = jnp.where(g_first, d, shift_down(d, d_top))
    s_u = jnp.where(g_first, s, shift_down(s, s_top))
    d_d = jnp.where(g_last, d, shift_up(d, d_bot))
    s_d = jnp.where(g_last, s, shift_up(s, s_bot))

    inv_l1 = jnp.float32(0.125)                  # Sobel kernels have L1 norm 8
    gx = (d_u + 2.0 * d + d_d) * inv_l1          # [[-1,0,1],[-2,0,2],[-1,0,1]]/8
    gy = (s_d - s_u) * inv_l1                    # [[-1,-2,-1],[0,0,0],[1,2,1]]/8

    # Two direct stores -- no stacked (n_img, 2, TH, W) temporary.
    o_ref[:, 0, :, :] = gx.astype(o_ref.dtype)
    o_ref[:, 1, :, :] = gy.astype(o_ref.dtype)


# --------------------------------------------------------------------------- #
# Planning helpers
# --------------------------------------------------------------------------- #
def _ceil_to(x, m):
    return -(-x // m) * m


def _padded_bytes(n_img, rows, w, itemsize):
    """VMEM footprint of one (n_img, rows, w) buffer after (8,128) padding."""
    return n_img * _ceil_to(max(rows, 1), 8) * _ceil_to(max(w, 1), 128) * itemsize


def _vmem_capacity_bytes():
    try:
        info = pltpu.get_tpu_info()
        cap = getattr(info, "vmem_capacity_bytes", None)
        if cap:
            return int(cap)
    except Exception:
        pass
    return 64 * 1024 * 1024          # conservative: v7x per-TensorCore VMEM


def _is_megacore():
    try:
        kind = jax.devices()[0].device_kind.lower()
    except Exception:
        return False
    return ("v7" in kind) or ("7x" in kind)


def _target_tile_bytes(cap, itemsize):
    # Per element: 2x in (double buffered) + 2x 2x out + ~32 B of f32 temps.
    # Keep the whole working set around cap/2 so the compiler has headroom.
    elems = (cap // 2) // (6 * itemsize + 32)
    return max(256 * 1024, elems * itemsize)


def _largest_divisor_at_most(n, limit):
    limit = max(1, min(n, limit))
    for d in range(limit, 0, -1):
        if n % d == 0:
            return d
    return 1


def _pick_images_per_block(n, want):
    """Prefer an exact divisor (no padded block); otherwise accept padding."""
    want = max(1, min(n, int(want)))
    div = _largest_divisor_at_most(n, want)
    return div if 2 * div >= want else want


def _pick_tile_h(h, want_rows):
    """Rows per H tile: multiple of 8 (or the full H), preferring a divisor."""
    if h <= 8:
        return h
    want_rows = max(8, min((int(want_rows) // 8) * 8, h))
    if want_rows >= h:
        return h
    div = 0
    for t in range(want_rows, 7, -8):
        if h % t == 0:
            div = t
            break
    return div if 2 * div >= want_rows else want_rows


def _plan(n, h, w, itemsize, target_bytes, force_multi):
    row_bytes = _ceil_to(w, 128) * itemsize
    img_bytes = _ceil_to(h, 8) * row_bytes

    if img_bytes <= target_bytes:
        n_img = _pick_images_per_block(n, target_bytes // img_bytes)
        tile_h = h
    else:
        n_img = 1
        tile_h = _pick_tile_h(h, target_bytes // row_bytes)

    # On a megacore chip make sure there are >= 2 grid steps to shard.
    if force_multi and pl.cdiv(n, n_img) * pl.cdiv(h, tile_h) < 2:
        if n >= 2:
            n_img = _pick_images_per_block(n, (n + 1) // 2)
        elif h >= 16:
            tile_h = _pick_tile_h(h, max(8, ((h // 2) // 8) * 8))
    return n_img, tile_h


# --------------------------------------------------------------------------- #
# Public wrapper
# --------------------------------------------------------------------------- #
def spatial_gradient(image, mode: str = "sobel", order: int = 1,
                     normalized: bool = True, *,
                     tile_h=None, images_per_block=None):
    """Pallas implementation of SpatialGradient forward (sobel, order=1)."""
    assert mode == "sobel" and order == 1, "only sobel / order=1 implemented"
    # TODO(synk): 'diff' mode, order=2 and normalized=False variants not wired up.
    assert normalized, "only normalized=True implemented"

    B, C, H, W = image.shape
    N = B * C
    x = image.reshape(N, H, W)                   # contiguous: no data movement
    itemsize = jnp.dtype(image.dtype).itemsize

    cap = _vmem_capacity_bytes()
    target = _target_tile_bytes(cap, itemsize)
    n_img, th = _plan(N, H, W, itemsize, target, _is_megacore())

    if images_per_block is not None:
        n_img = max(1, min(int(images_per_block), N))
    if tile_h is not None:
        t = int(tile_h)
        th = H if (t >= H or H <= 8) else max(8, (t // 8) * 8)

    grid = (pl.cdiv(N, n_img), pl.cdiv(H, th))
    tiled = th < H

    # XLU rolls need a layout-aligned lane axis; otherwise keep the concat path.
    # Narrow images (W % 128 != 0) also pay masked lane stores -- correct, but a
    # production dispatcher would route them to the plain XLA conv path.
    # TODO(synk): optional XLA fallback for W % 128 != 0.
    lane_aligned = (W % 128 == 0)
    roll_w = lane_aligned
    roll_h = lane_aligned and th >= 8 and th % 8 == 0

    kernel = functools.partial(_sobel_kernel, tiled_h=tiled, roll_w=roll_w,
                               roll_h=roll_h, h_total=H)

    in_specs = [pl.BlockSpec((n_img, th, W), lambda n, i: (n, i, 0))]
    operands = [x]
    if tiled:
        th8 = th // 8                  # th is a multiple of 8 whenever tiled
        h8_last = pl.cdiv(H, 8) - 1
        in_specs.append(pl.BlockSpec(
            (n_img, 8, W), lambda n, i: (n, jnp.maximum(i * th8 - 1, 0), 0)))
        in_specs.append(pl.BlockSpec(
            (n_img, 8, W), lambda n, i: (n, jnp.minimum((i + 1) * th8, h8_last), 0)))
        operands += [x, x]
    out_spec = pl.BlockSpec((n_img, 2, th, W), lambda n, i: (n, 0, i, 0))

    # VMEM accounting: double-buffered in/out (+ halos) + in-kernel f32 temps.
    pad_in = _padded_bytes(n_img, th, W, itemsize)
    pad_halo = _padded_bytes(n_img, 8, W, itemsize) if tiled else 0
    pad_out = 2 * pad_in
    scratch = 8 * _padded_bytes(n_img, th, W, 4)
    need = 2 * (pad_in + 2 * pad_halo + pad_out) + scratch + (4 << 20)
    vmem_limit = int(min(max(need, 32 << 20), (cap * 3) // 4))

    out = pl.pallas_call(
        kernel,
        out_shape=jax.ShapeDtypeStruct((N, 2, H, W), image.dtype),
        grid_spec=pl.GridSpec(grid=grid, in_specs=in_specs, out_specs=out_spec),
        compiler_params=pltpu.CompilerParams(
            dimension_semantics=("parallel", "parallel"),
            vmem_limit_bytes=vmem_limit,
        ),
    )(*operands)

    return out.reshape(B, C, 2, H, W)


# --------------------------------------------------------------------------- #
# Pure-JAX reference and self-check
# --------------------------------------------------------------------------- #
def _reference(image):
    """Pure-JAX reference (same math as the torch module)."""
    B, C, H, W = image.shape
    x = image.reshape(B * C, H, W).astype(jnp.float32)
    xp = jnp.pad(x, ((0, 0), (1, 1), (1, 1)), mode="edge")
    kgx = jnp.array([[-1., 0., 1.], [-2., 0., 2.], [-1., 0., 1.]]) / 8.0
    kgy = kgx.T
    gx = jnp.zeros_like(x)
    gy = jnp.zeros_like(x)
    for dy in range(3):
        for dx in range(3):
            win = xp[:, dy:dy + H, dx:dx + W]
            gx = gx + kgx[dy, dx] * win
            gy = gy + kgy[dy, dx] * win
    return jnp.stack([gx, gy], axis=1).reshape(B, C, 2, H, W).astype(image.dtype)


if __name__ == "__main__":
    key = jax.random.PRNGKey(0)

    checks = [
        # (shape, wrapper kwargs)
        ((2, 4, 16, 128), {}),               # lane-dense single-block fast path (rolls)
        ((1, 3, 32, 128), {"tile_h": 8}),    # exercises H tiling + 8-row halo blocks
        ((2, 4, 16, 16), {}),                # narrow width: concatenate fallback path
    ]
    for idx, (shape, kw) in enumerate(checks):
        k = jax.random.fold_in(key, idx)
        x = jax.random.uniform(k, shape, dtype=jnp.float32)
        out = jax.block_until_ready(spatial_gradient(x, **kw))
        ref = _reference(x)
        assert out.shape == (shape[0], shape[1], 2, shape[2], shape[3])
        assert jnp.allclose(out, ref, atol=1e-5, rtol=1e-5), f"mismatch for {shape}"

    print("KERNEL_OK")
</pallas_src>

<mosaic_0001>
module attributes {stable_mosaic.version = 11 : i64} {
  func.func @_sobel_kernel(%arg0: i32, %arg1: i32, %arg2: memref<8x16x128xf32, #tpu.memory_space<vmem>>, %arg3: memref<8x2x16x128xf32, #tpu.memory_space<vmem>>) attributes {dimension_semantics = [#tpu.dimension_semantics<parallel>, #tpu.dimension_semantics<parallel>], iteration_bounds = array<i64: 1, 1>, scalar_prefetch = 0 : i64, scratch_operands = 0 : i64, tpu.core_type = #tpu.core_type<tc>, window_params = [{transform_indices = @transform_0, window_bounds = array<i64: 8, 16, 128>}, {transform_indices = @transform_1, window_bounds = array<i64: 8, 2, 16, 128>}]} {
    %c0 = arith.constant 0 : index
    %c0_0 = arith.constant 0 : index
    %c0_1 = arith.constant 0 : index
    %0 = vector.load %arg2[%c0, %c0_0, %c0_1] : memref<8x16x128xf32, #tpu.memory_space<vmem>>, vector<8x16x128xf32>
    %1 = tpu.iota {dimensions = array<i32: 2>} : vector<1x1x128xi32>
    %c0_i32 = arith.constant 0 : i32
    %2 = vector.broadcast %c0_i32 : i32 to vector<1x1x128xi32>
    %3 = arith.cmpi eq, %1, %2 : vector<1x1x128xi32>
    %c127_i32 = arith.constant 127 : i32
    %4 = vector.broadcast %c127_i32 : i32 to vector<1x1x128xi32>
    %5 = arith.cmpi eq, %1, %4 : vector<1x1x128xi32>
    %c1_i32 = arith.constant 1 : i32
    %6 = tpu.dynamic_rotate %0 by %c1_i32 dim 2 : vector<8x16x128xf32>, i32 -> vector<8x16x128xf32>
    %7 = vector.shape_cast %3 : vector<1x1x128xi1> to vector<1x1x128xi1>
    %8 = vector.broadcast %7 : vector<1x1x128xi1> to vector<8x16x128xi1>
    %9 = arith.select %8, %0, %6 : vector<8x16x128xi1>, vector<8x16x128xf32>
    %c127_i32_2 = arith.constant 127 : i32
    %10 = tpu.dynamic_rotate %0 by %c127_i32_2 dim 2 : vector<8x16x128xf32>, i32 -> vector<8x16x128xf32>
    %11 = vector.shape_cast %5 : vector<1x1x128xi1> to vector<1x1x128xi1>
    %12 = vector.broadcast %11 : vector<1x1x128xi1> to vector<8x16x128xi1>
    %13 = arith.select %12, %0, %10 : vector<8x16x128xi1>, vector<8x16x128xf32>
    %14 = arith.subf %13, %9 : vector<8x16x128xf32>
    %cst = arith.constant 2.000000e+00 : f32
    %15 = vector.broadcast %cst : f32 to vector<8x16x128xf32>
    %16 = arith.mulf %15, %0 : vector<8x16x128xf32>
    %17 = arith.addf %9, %16 : vector<8x16x128xf32>
    %18 = arith.addf %17, %13 : vector<8x16x128xf32>
    %19 = vector.extract_strided_slice %14 {offsets = [0, 0, 0], sizes = [8, 1, 128], strides = [1, 1, 1]} : vector<8x16x128xf32> to vector<8x1x128xf32>
    %20 = vector.extract_strided_slice %18 {offsets = [0, 0, 0], sizes = [8, 1, 128], strides = [1, 1, 1]} : vector<8x16x128xf32> to vector<8x1x128xf32>
    %21 = vector.extract_strided_slice %14 {offsets = [0, 15, 0], sizes = [8, 1, 128], strides = [1, 1, 1]} : vector<8x16x128xf32> to vector<8x1x128xf32>
    %22 = vector.extract_strided_slice %18 {offsets = [0, 15, 0], sizes = [8, 1, 128], strides = [1, 1, 1]} : vector<8x16x128xf32> to vector<8x1x128xf32>
    %23 = tpu.iota {dimensions = array<i32: 1>} : vector<1x16x1xi32>
    %c0_i32_3 = arith.constant 0 : i32
    %24 = vector.broadcast %c0_i32_3 : i32 to vector<1x16x1xi32>
    %25 = arith.cmpi eq, %23, %24 : vector<1x16x1xi32>
    %c15_i32 = arith.constant 15 : i32
    %26 = vector.broadcast %c15_i32 : i32 to vector<1x16x1xi32>
    %27 = arith.cmpi eq, %23, %26 : vector<1x16x1xi32>
    %c16_i32 = arith.constant 16 : i32
    %28 = arith.muli %arg1, %c16_i32 : i32
    %29 = vector.broadcast %28 : i32 to vector<1x16x1xi32>
    %30 = arith.addi %23, %29 : vector<1x16x1xi32>
    %c0_i32_4 = arith.constant 0 : i32
    %31 = vector.broadcast %c0_i32_4 : i32 to vector<1x16x1xi32>
    %32 = arith.cmpi eq, %30, %31 : vector<1x16x1xi32>
    %c15_i32_5 = arith.constant 15 : i32
    %33 = vector.broadcast %c15_i32_5 : i32 to vector<1x16x1xi32>
    %34 = arith.cmpi eq, %30, %33 : vector<1x16x1xi32>
    %c1_i32_6 = arith.constant 1 : i32
    %35 = tpu.dynamic_rotate %14 by %c1_i32_6 dim 1 : vector<8x16x128xf32>, i32 -> vector<8x16x128xf32>
    %36 = vector.shape_cast %25 : vector<1x16x1xi1> to vector<1x16x1xi1>
    %37 = vector.broadcast %36 : vector<1x16x1xi1> to vector<8x16x128xi1>
    %38 = vector.shape_cast %19 : vector<8x1x128xf32> to vector<8x1x128xf32>
    %39 = vector.broadcast %38 : vector<8x1x128xf32> to vector<8x16x128xf32>
    %40 = arith.select %37, %39, %35 : vector<8x16x128xi1>, vector<8x16x128xf32>
    %41 = vector.shape_cast %32 : vector<1x16x1xi1> to vector<1x16x1xi1>
    %42 = vector.broadcast %41 : vector<1x16x1xi1> to vector<8x16x128xi1>
    %43 = arith.select %42, %14, %40 : vector<8x16x128xi1>, vector<8x16x128xf32>
    %c1_i32_7 = arith.constant 1 : i32
    %44 = tpu.dynamic_rotate %18 by %c1_i32_7 dim 1 : vector<8x16x128xf32>, i32 -> vector<8x16x128xf32>
    %45 = vector.shape_cast %25 : vector<1x16x1xi1> to vector<1x16x1xi1>
    %46 = vector.broadcast %45 : vector<1x16x1xi1> to vector<8x16x128xi1>
    %47 = vector.shape_cast %20 : vector<8x1x128xf32> to vector<8x1x128xf32>
    %48 = vector.broadcast %47 : vector<8x1x128xf32> to vector<8x16x128xf32>
    %49 = arith.select %46, %48, %44 : vector<8x16x128xi1>, vector<8x16x128xf32>
    %50 = vector.shape_cast %32 : vector<1x16x1xi1> to vector<1x16x1xi1>
    %51 = vector.broadcast %50 : vector<1x16x1xi1> to vector<8x16x128xi1>
    %52 = arith.select %51, %18, %49 : vector<8x16x128xi1>, vector<8x16x128xf32>
    %c15_i32_8 = arith.constant 15 : i32
    %53 = tpu.dynamic_rotate %14 by %c15_i32_8 dim 1 : vector<8x16x128xf32>, i32 -> vector<8x16x128xf32>
    %54 = vector.shape_cast %27 : vector<1x16x1xi1> to vector<1x16x1xi1>
    %55 = vector.broadcast %54 : vector<1x16x1xi1> to vector<8x16x128xi1>
    %56 = vector.shape_cast %21 : vector<8x1x128xf32> to vector<8x1x128xf32>
    %57 = vector.broadcast %56 : vector<8x1x128xf32> to vector<8x16x128xf32>
    %58 = arith.select %55, %57, %53 : vector<8x16x128xi1>, vector<8x16x128xf32>
    %59 = vector.shape_cast %34 : vector<1x16x1xi1> to vector<1x16x1xi1>
    %60 = vector.broadcast %59 : vector<1x16x1xi1> to vector<8x16x128xi1>
    %61 = arith.select %60, %14, %58 : vector<8x16x128xi1>, vector<8x16x128xf32>
    %c15_i32_9 = arith.constant 15 : i32
    %62 = tpu.dynamic_rotate %18 by %c15_i32_9 dim 1 : vector<8x16x128xf32>, i32 -> vector<8x16x128xf32>
    %63 = vector.shape_cast %27 : vector<1x16x1xi1> to vector<1x16x1xi1>
    %64 = vector.broadcast %63 : vector<1x16x1xi1> to vector<8x16x128xi1>
    %65 = vector.shape_cast %22 : vector<8x1x128xf32> to vector<8x1x128xf32>
    %66 = vector.broadcast %65 : vector<8x1x128xf32> to vector<8x16x128xf32>
    %67 = arith.select %64, %66, %62 : vector<8x16x128xi1>, vector<8x16x128xf32>
    %68 = vector.shape_cast %34 : vector<1x16x1xi1> to vector<1x16x1xi1>
    %69 = vector.broadcast %68 : vector<1x16x1xi1> to vector<8x16x128xi1>
    %70 = arith.select %69, %18, %67 : vector<8x16x128xi1>, vector<8x16x128xf32>
    %cst_10 = arith.constant 2.000000e+00 : f32
    %71 = vector.broadcast %cst_10 : f32 to vector<8x16x128xf32>
    %72 = arith.mulf %71, %14 : vector<8x16x128xf32>
    %73 = arith.addf %43, %72 : vector<8x16x128xf32>
    %74 = arith.addf %73, %61 : vector<8x16x128xf32>
    %cst_11 = arith.constant 1.250000e-01 : f32
    %75 = vector.broadcast %cst_11 : f32 to vector<8x16x128xf32>
    %76 = arith.mulf %74, %75 : vector<8x16x128xf32>
    %77 = arith.subf %70, %52 : vector<8x16x128xf32>
    %cst_12 = arith.constant 1.250000e-01 : f32
    %78 = vector.broadcast %cst_12 : f32 to vector<8x16x128xf32>
    %79 = arith.mulf %77, %78 : vector<8x16x128xf32>
    %c0_13 = arith.constant 0 : index
    %c0_14 = arith.constant 0 : index
    %c0_15 = arith.constant 0 : index
    %c0_16 = arith.constant 0 : index
    %80 = vector.load %arg3[%c0_13, %c0_14, %c0_15, %c0_16] : memref<8x2x16x128xf32, #tpu.memory_space<vmem>>, vector<8x1x16x128xf32>
    %81 = vector.shape_cast %80 : vector<8x1x16x128xf32> to vector<8x16x128xf32>
    %82 = vector.shape_cast %76 : vector<8x16x128xf32> to vector<8x1x16x128xf32>
    tpu.vector_store %arg3[%c0_13, %c0_14, %c0_15, %c0_16], %82 {strides = array<i32>} : memref<8x2x16x128xf32, #tpu.memory_space<vmem>>, vector<8x1x16x128xf32>,
    %c0_17 = arith.constant 0 : index
    %c1 = arith.constant 1 : index
    %c0_18 = arith.constant 0 : index
    %c0_19 = arith.constant 0 : index
    %83 = vector.load %arg3[%c0_17, %c1, %c0_18, %c0_19] : memref<8x2x16x128xf32, #tpu.memory_space<vmem>>, vector<8x1x16x128xf32>
    %84 = vector.shape_cast %83 : vector<8x1x16x128xf32> to vector<8x16x128xf32>
    %85 = vector.shape_cast %79 : vector<8x16x128xf32> to vector<8x1x16x128xf32>
    tpu.vector_store %arg3[%c0_17, %c1, %c0_18, %c0_19], %85 {strides = array<i32>} : memref<8x2x16x128xf32, #tpu.memory_space<vmem>>, vector<8x1x16x128xf32>,
    return
  }
  func.func @transform_0(%arg0: i32, %arg1: i32) -> (i32, i32, i32) {
    %c0_i32 = arith.constant 0 : i32
    %c0_i32_0 = arith.constant 0 : i32
    return %arg0, %arg1, %c0_i32 : i32, i32, i32
  }
  func.func @transform_1(%arg0: i32, %arg1: i32) -> (i32, i32, i32, i32) {
    %c0_i32 = arith.constant 0 : i32
    %c0_i32_0 = arith.constant 0 : i32
    %c0_i32_1 = arith.constant 0 : i32
    return %arg0, %c0_i32, %arg1, %c0_i32_0 : i32, i32, i32, i32
  }
}

</mosaic_0001>

<bundles_post_ra>
// kernel: tpu_custom_call.1
= control target key start
LH: loop header
LB: loop body
LE: loop exit
PB: predicated region body
PF: predicated region fallthrough
CT: control target
= control target key end

     0   :  { %6 = vsyncpa [#allocation3], 0  ;;  %s1478_s0 = inlined_call_operand.hbm [shape: f32[8,16,128], index: 0, kind: input, shape index: {}]   ;;  %s1479_s1 = inlined_call_operand.hbm [shape: f32[8,2,16,128], index: 1, kind: output, shape index: {}]  }
   0x1   :  { %7 = vsyncpa [#allocation4], 0  ;;  %s820_s6 = smov [#allocation2]  }
   0x2   :  { %s13_s7 = sshll.u32 %s820_s6, 4  ;;  %s14_s7 = int_to_ptr.vmem [resolvable:$true] %s13_s7 }
   0x3   :  { %s784_s8 = scalar_lea.vmem %s14_s7, 2048  ;;  %p789_p1 = scmp.lt.s32.totalorder %s14_s7, %s14_s7 }
   0x4   :  { %p785_p0 = scmp.ne.s32.totalorder %s14_s7, %s784_s8  ;;  %p790_p2 = scmp.lt.s32.totalorder %s784_s8, %s784_s8 }
   0x6   :  { %p791_p3 = por %p790_p2, %p789_p1 }
   0x8   :  { %p792_p4 = pnand %p791_p3, %p785_p0 }
   0xa   :  { %795 = shalt.err (!%p792_p4)
}
   0xb   :  { %s821_s9 = smov 128   ;;  %s822_s10 = smov 8  }
   0xc   :  { %19 = dma.hbm_to_vmem [thread:$0]  %s1478_s0, 2048, %s14_s7, [#allocation3], %s821_s9, %s821_s9, %s822_s10  }
   0xd   :  { %816 = dma.done.wait [#allocation3], 2048  }
   0xe   :  { %817 = vsyncadd [#allocation3], 4294965248  ;;  %v842_v0 = vld [vmem:[#allocation2 + $0x10] sm:$0xff]  ;;  %v844_v1 = vld [vmem:[#allocation2] sm:$0xff]  ;;  %s823_s13 = smov 1   ;;  %s824_s0 = smov 127   ;;  %v39_v24 = vlaneseq }
   0xf   :  { %47 = vrot.lane.b32.xlu1 %v842_v0, %s823_s13  ;;  %43 = vrot.lane.b32.xlu0 %v844_v1, %s823_s13  ;;  %v848_v2 = vld [vmem:[#allocation2 + $0x18] sm:$0xff]  ;;  %v850_v3 = vld [vmem:[#allocation2 + $0x8] sm:$0xff]  ;;  %v856_v5 = vld [vmem:[#allocation2 + $0x20] sm:$0xff]  ;;  %v161_v34 = vmul.f32 2.0, %v842_v0  ;;  %v159_v35 = vmul.f32 2.0, %v844_v1  ;;  %s825_s14 = smov [#allocation5]  }
  0x10   :  { %v854_v4 = vld [vmem:[#allocation2 + $0x28] sm:$0xff]  ;;  %v860_v6 = vld [vmem:[#allocation2 + $0x38] sm:$0xff]  ;;  %v862_v7 = vld [vmem:[#allocation2 + $0x30] sm:$0xff]  ;;  %v906_v27 = vand.u32 127, %v39_v24  ;;  %v908_v28 = vshrl.u32 %v39_v24, 7  ;;  %v162_v36 = vmul.f32 2.0, %v848_v2 }
  0x11   :  { %v866_v8 = vld [vmem:[#allocation2 + $0x48] sm:$0xff]  ;;  %v868_v9 = vld [vmem:[#allocation2 + $0x40] sm:$0xff]  ;;  %v872_v10 = vld [vmem:[#allocation2 + $0x58] sm:$0xff]  ;;  %v160_v37 = vmul.f32 2.0, %v850_v3  ;;  %v164_v38 = vmul.f32 2.0, %v854_v4  ;;  %v163_v39 = vmul.f32 2.0, %v856_v5 }
  0x12   :  { %v874_v11 = vld [vmem:[#allocation2 + $0x50] sm:$0xff]  ;;  %v878_v12 = vld [vmem:[#allocation2 + $0x68] sm:$0xff]  ;;  %v880_v13 = vld [vmem:[#allocation2 + $0x60] sm:$0xff]  ;;  %vm41_vm0 = vcmp.eq.s32.totalorder %v906_v27, 0  ;;  %v912_v31 = vadd.s32 8, %v908_v28  ;;  %v915_v32 = vsub.s32 0, %v908_v28 }
  0x13   :  { %49 = vrot.lane.b32.xlu1 %v848_v2, %s823_s13  ;;  %45 = vrot.lane.b32.xlu0 %v850_v3, %s823_s13  ;;  %1487 = vst [vmem:[#allocation8_spill] sm:$0xff] %v880_v13  ;;  %v884_v14 = vld [vmem:[#allocation2 + $0x78] sm:$0xff]  ;;  %v886_v15 = vld [vmem:[#allocation2 + $0x70] sm:$0xff]  ;;  %v918_v33 = vsub.s32 7, %v908_v28  ;;  %v166_v40 = vmul.f32 2.0, %v860_v6  ;;  %v165_v43 = vmul.f32 2.0, %v862_v7 }
  0x14   :  { %1488 = vst [vmem:[#allocation9_spill] sm:$0xff] %v884_v14  ;;  %1489 = vst [vmem:[#allocation10_spill] sm:$0xff] %v886_v15  ;;  %v168_v44 = vmul.f32 2.0, %v866_v8  ;;  %v167_v47 = vmul.f32 2.0, %v868_v9  ;;  %v170_v48 = vmul.f32 2.0, %v872_v10  ;;  %v169_v49 = vmul.f32 2.0, %v874_v11 }
  0x15   :  { %v943_v50 = vmul.f32 2.0, %v878_v12  ;;  %v954_v53 = vmul.f32 2.0, %v880_v13  ;;  %v957_v54 = vmul.f32 2.0, %v884_v14  ;;  %vm238_vm1 = vcmp.lt.s32.totalorder %v908_v28, 1  ;;  %s758_s15 = sshll.u32 %s825_s14, 4  ;;  %s759_s15 = int_to_ptr.vmem [resolvable:$true] %s758_s15 }
  0x16   :  { %vm210_vm2 = vcmp.eq.s32.totalorder %v908_v28, 0  ;;  %vm439_vm3 = vcmp.lt.s32.totalorder %v908_v28, 7  ;;  %v986_v62 = vmul.f32 2.0, %v886_v15  ;;  %vm42_vm4 = vcmp.eq.s32.totalorder %v906_v27, 127  ;;  %s796_s16 = scalar_lea.vmem %s759_s15, 4096  ;;  %p801_p6 = scmp.lt.s32.totalorder %s759_s15, %s759_s15 }
  0x17   :  { %53 = vrot.lane.b32.xlu1 %v854_v4, %s823_s13  ;;  %51 = vrot.lane.b32.xlu0 %v856_v5, %s823_s13  ;;  %1491 = vst [vmem:[#allocation12_spill] sm:$0xff] %v954_v53  ;;  %1492 = vst [vmem:[#allocation13_spill] sm:$0xff] %v957_v54  ;;  %vm213_vm5 = vcmp.eq.s32.totalorder %v912_v31, 15  ;;  %p797_p5 = scmp.ne.s32.totalorder %s759_s15, %s796_s16  ;;  %p802_p7 = scmp.lt.s32.totalorder %s796_s16, %s796_s16 }
  0x18   :  { %1494 = vst [vmem:[#allocation15_spill] sm:$0xff] %v986_v62 }
  0x19   :  { %p803_p8 = por %p802_p7, %p801_p6 }
  0x1b   :  { %57 = vrot.lane.b32.xlu1 %v860_v6, %s823_s13  ;;  %55 = vrot.lane.b32.xlu0 %v862_v7, %s823_s13  ;;  %p804_p9 = pnand %p803_p8, %p797_p5 }
  0x1f   :  { %61 = vrot.lane.b32.xlu1 %v866_v8, %s823_s13  ;;  %59 = vrot.lane.b32.xlu0 %v868_v9, %s823_s13 }
  0x23   :  { %65 = vrot.lane.b32.xlu1 %v872_v10, %s823_s13  ;;  %63 = vrot.lane.b32.xlu0 %v874_v11, %s823_s13 }
  0x27   :  { %69 = vrot.lane.b32.xlu1 %v878_v12, %s823_s13  ;;  %67 = vrot.lane.b32.xlu0 %v880_v13, %s823_s13 }
  0x2b   :  { %73 = vrot.lane.b32.xlu1 %v884_v14, %s823_s13  ;;  %71 = vrot.lane.b32.xlu0 %v886_v15, %s823_s13 }
  0x2f   :  { %95 = vrot.lane.b32.xlu1 %v850_v3, %s824_s0  ;;  %93 = vrot.lane.b32.xlu0 %v844_v1, %s824_s0 }
  0x33   :  { %99 = vrot.lane.b32.xlu1 %v848_v2, %s824_s0  ;;  %97 = vrot.lane.b32.xlu0 %v842_v0, %s824_s0 }
  0x37   :  { %103 = vrot.lane.b32.xlu1 %v854_v4, %s824_s0  ;;  %101 = vrot.lane.b32.xlu0 %v856_v5, %s824_s0 }
  0x3b   :  { %107 = vrot.lane.b32.xlu1 %v860_v6, %s824_s0  ;;  %105 = vrot.lane.b32.xlu0 %v862_v7, %s824_s0 }
  0x3f   :  { %111 = vrot.lane.b32.xlu1 %v866_v8, %s824_s0  ;;  %109 = vrot.lane.b32.xlu0 %v868_v9, %s824_s0 }
  0x43   :  { %115 = vrot.lane.b32.xlu1 %v872_v10, %s824_s0  ;;  %113 = vrot.lane.b32.xlu0 %v874_v11, %s824_s0 }
  0x47   :  { %119 = vrot.lane.b32.xlu1 %v878_v12, %s824_s0  ;;  %117 = vrot.lane.b32.xlu0 %v880_v13, %s824_s0 }
  0x4b   :  { %123 = vrot.lane.b32.xlu1 %v884_v14, %s824_s0  ;;  %121 = vrot.lane.b32.xlu0 %v886_v15, %s824_s0 }
  0x81   :  { %v48_v16 = vpop.permute.xlu1 %47  ;;  %v44_v17 = vpop.permute.xlu0 %43 }
  0x82   :  { %v948_v51 = vsel %vm41_vm0, %v842_v0, %v48_v16  ;;  %v77_v52 = vsel %vm41_vm0, %v844_v1, %v44_v17 }
  0x83   :  { %v995_v16 = vadd.f32 %v161_v34, %v948_v51  ;;  %v175_v17 = vadd.f32 %v159_v35, %v77_v52 }
  0x85   :  { %v50_v18 = vpop.permute.xlu1 %49  ;;  %v46_v19 = vpop.permute.xlu0 %45 }
  0x86   :  { %v963_v55 = vsel %vm41_vm0, %v848_v2, %v50_v18  ;;  %v78_v56 = vsel %vm41_vm0, %v850_v3, %v46_v19 }
  0x89   :  { %v54_v20 = vpop.permute.xlu1 %53  ;;  %v52_v21 = vpop.permute.xlu0 %51 }
  0x8a   :  { %v971_v57 = vsel %vm41_vm0, %v854_v4, %v54_v20  ;;  %v976_v58 = vsel %vm41_vm0, %v856_v5, %v52_v21  ;;  %v1009_v20 = vadd.f32 %v162_v36, %v963_v55  ;;  %v176_v21 = vadd.f32 %v160_v37, %v78_v56 }
  0x8b   :  { %v1012_v24 = vadd.f32 %v164_v38, %v971_v57  ;;  %v1015_v34 = vadd.f32 %v163_v39, %v976_v58 }
  0x8d   :  { %v58_v22 = vpop.permute.xlu1 %57  ;;  %v56_v23 = vpop.permute.xlu0 %55 }
  0x8e   :  { %v1000_v18 = vsel %vm41_vm0, %v860_v6, %v58_v22  ;;  %v1005_v19 = vsel %vm41_vm0, %v862_v7, %v56_v23 }
  0x8f   :  { %v1041_v39 = vadd.f32 %v165_v43, %v1005_v19 }
  0x91   :  { %v62_v25 = vpop.permute.xlu1 %61  ;;  %v60_v26 = vpop.permute.xlu0 %59 }
  0x92   :  { %v1020_v22 = vsel %vm41_vm0, %v866_v8, %v62_v25  ;;  %v1025_v23 = vsel %vm41_vm0, %v868_v9, %v60_v26  ;;  %v1038_v25 = vadd.f32 %v166_v40, %v1000_v18 }
  0x93   :  { %v1053_v40 = vadd.f32 %v167_v47, %v1025_v23 }
  0x95   :  { %v66_v29 = vpop.permute.xlu1 %65  ;;  %v64_v30 = vpop.permute.xlu0 %63 }
  0x96   :  { %v1030_v35 = vsel %vm41_vm0, %v872_v10, %v66_v29  ;;  %v1035_v36 = vsel %vm41_vm0, %v874_v11, %v64_v30 }
  0x97   :  { %1496 = vst [vmem:[#allocation17_spill] sm:$0xff] %v1035_v36  ;;  %v1056_v43 = vadd.f32 %v170_v48, %v1030_v35 }
  0x99   :  { %v70_v41 = vpop.permute.xlu1 %69  ;;  %v68_v42 = vpop.permute.xlu0 %67 }
  0x9a   :  { %v932_v45 = vsel %vm41_vm0, %v878_v12, %v70_v41  ;;  %v937_v46 = vsel %vm41_vm0, %v880_v13, %v68_v42 }
  0x9b   :  { %1490 = vst [vmem:[#allocation11_spill] sm:$0xff] %v937_v46 }
  0x9d   :  { %v74_v59 = vpop.permute.xlu1 %73  ;;  %v72_v60 = vpop.permute.xlu0 %71 }
  0x9e   :  { %v983_v61 = vsel %vm41_vm0, %v884_v14, %v74_v59  ;;  %v991_v63 = vsel %vm41_vm0, %v886_v15, %v72_v60  ;;  %v1050_v60 = vadd.f32 %v168_v44, %v1020_v22  ;;  %v1059_v15 = vadd.f32 %v169_v49, %v1035_v36 }
  0x9f   :  { %1493 = vst [vmem:[#allocation14_spill] sm:$0xff] %v983_v61  ;;  %1495 = vst [vmem:[#allocation16_spill] sm:$0xff] %v991_v63 }
  0xa0   :  { %1497 = vst [vmem:[#allocation18_spill] sm:$0xff] %v1059_v15 }
  0xa1   :  { %v96_v37 = vpop.permute.xlu1 %95  ;;  %v94_v38 = vpop.permute.xlu0 %93 }
  0xa2   :  { %v128_v26 = vsel %vm42_vm4, %v850_v3, %v96_v37  ;;  %v127_v29 = vsel %vm42_vm4, %v844_v1, %v94_v38 }
  0xa3   :  { %v144_v41 = vsub.f32 %v128_v26, %v78_v56  ;;  %v192_v42 = vadd.f32 %v176_v21, %v128_v26  ;;  %v143_v30 = vsub.f32 %v127_v29, %v77_v52  ;;  %v191_v59 = vadd.f32 %v175_v17, %v127_v29 }
  0xa5   :  { %v230_v3 = vrot.slane %v144_v41, 7  ;;  %v335_v37 = vrot.slane %v192_v42, 7  ;;  %v431_v62 = vrot.slane %v144_v41, 1  ;;  %v463_v1 = vrot.slane %v144_v41, %v918_v33  ;;  %v98_v46 = vpop.permute.xlu0 %97 }
  0xa6   :  { %v536_v56 = vrot.slane %v192_v42, 1  ;;  %v563_v52 = vrot.slane %v192_v42, %v918_v33  ;;  %v625_v17 = vmul.f32 2.0, %v144_v41  ;;  %v222_v44 = vrot.slane %v143_v30, 7 }
  0xa7   :  { %v262_v21 = vrot.slane %v143_v30, %v915_v32  ;;  %v327_v47 = vrot.slane %v191_v59, 7  ;;  %v362_v38 = vrot.slane %v191_v59, %v915_v32  ;;  %v423_v48 = vrot.slane %v143_v30, 1 }
  0xa8   :  { %v239_v49 = vsel %vm238_vm1, %v222_v44, %v230_v3  ;;  %v247_v26 = vsel %vm238_vm1, %v230_v3, %v222_v44  ;;  %v528_v29 = vrot.slane %v191_v59, 1  ;;  %v624_v63 = vmul.f32 2.0, %v143_v30 }
  0xa9   :  { %v291_v14 = vsel %vm210_vm2, %v262_v21, %v247_v26  ;;  %v343_v13 = vsel %vm238_vm1, %v327_v47, %v335_v37  ;;  %v351_v54 = vsel %vm238_vm1, %v335_v37, %v327_v47  ;;  %v440_v61 = vsel %vm439_vm3, %v423_v48, %v431_v62  ;;  %v100_v26 = vpop.permute.xlu1 %99 }
  0xaa   :  { %v311_v53 = vsel %vm210_vm2, %v143_v30, %v291_v14  ;;  %v391_v3 = vsel %vm210_vm2, %v362_v38, %v351_v54  ;;  %v448_v44 = vsel %vm439_vm3, %v431_v62, %v423_v48  ;;  %v544_v21 = vsel %vm439_vm3, %v528_v29, %v536_v56 }
  0xab   :  { %v407_v37 = vsel %vm210_vm2, %v191_v59, %v391_v3  ;;  %v493_v47 = vsel %vm213_vm5, %v463_v1, %v448_v44  ;;  %v552_v14 = vsel %vm439_vm3, %v536_v56, %v528_v29  ;;  %v640_v30 = vadd.f32 %v624_v63, %v311_v53 }
  0xac   :  { %v513_v54 = vsel %vm213_vm5, %v144_v41, %v493_v47  ;;  %v593_v62 = vsel %vm213_vm5, %v563_v52, %v552_v14  ;;  %v641_v38 = vadd.f32 %v625_v17, %v239_v49  ;;  %v688_v48 = vsub.f32 %v544_v21, %v407_v37 }
  0xad   :  { %v609_v15 = vsel %vm213_vm5, %v192_v42, %v593_v62  ;;  %v656_v36 = vadd.f32 %v640_v30, %v440_v61  ;;  %v130_v59 = vsel %vm42_vm4, %v848_v2, %v100_v26  ;;  %v129_v53 = vsel %vm42_vm4, %v842_v0, %v98_v46 }
  0xae   :  { %v657_v63 = vadd.f32 %v641_v38, %v513_v54  ;;  %v689_v1 = vsub.f32 %v609_v15, %v343_v13  ;;  %v704_v41 = vmul.f32 0.125, %v688_v48  ;;  %v146_v56 = vsub.f32 %v130_v59, %v963_v55 }
  0xaf   :  { %v672_v52 = vmul.f32 0.125, %v656_v36  ;;  %v194_v17 = vadd.f32 %v1009_v20, %v130_v59  ;;  %v145_v49 = vsub.f32 %v129_v53, %v948_v51  ;;  %v193_v61 = vadd.f32 %v995_v16, %v129_v53  ;;  %v104_v59 = vpop.permute.xlu1 %103  ;;  %v102_v53 = vpop.permute.xlu0 %101 }
  0xb0   :  { %v673_v42 = vmul.f32 0.125, %v657_v63  ;;  %v705_v29 = vmul.f32 0.125, %v689_v1  ;;  %737 = vst [vmem:[#allocation5 + $0x10] sm:$0xff] %v704_v41  ;;  %v231_v2 = vrot.slane %v146_v56, 7  ;;  %v432_v3 = vrot.slane %v146_v56, 1 }
  0xb1   :  { %720 = vst [vmem:[#allocation5] sm:$0xff] %v672_v52  ;;  %v336_v44 = vrot.slane %v194_v17, 7  ;;  %v467_v0 = vrot.slane %v146_v56, %v918_v33  ;;  %v537_v13 = vrot.slane %v194_v17, 1  ;;  %v567_v15 = vrot.slane %v194_v17, %v918_v33 }
  0xb2   :  { %721 = vst [vmem:[#allocation5 + $0x8] sm:$0xff] %v673_v42  ;;  %738 = vst [vmem:[#allocation5 + $0x18] sm:$0xff] %v705_v29  ;;  %v627_v46 = vmul.f32 2.0, %v146_v56  ;;  %v223_v55 = vrot.slane %v145_v49, 7  ;;  %v266_v51 = vrot.slane %v145_v49, %v915_v32  ;;  %v328_v20 = vrot.slane %v193_v61, 7 }
  0xb3   :  { %v366_v16 = vrot.slane %v193_v61, %v915_v32  ;;  %v424_v36 = vrot.slane %v145_v49, 1  ;;  %v529_v21 = vrot.slane %v193_v61, 1  ;;  %v626_v26 = vmul.f32 2.0, %v145_v49 }
  0xb4   :  { %v240_v37 = vsel %vm238_vm1, %v223_v55, %v231_v2  ;;  %v248_v47 = vsel %vm238_vm1, %v231_v2, %v223_v55  ;;  %v344_v14 = vsel %vm238_vm1, %v328_v20, %v336_v44  ;;  %v352_v30 = vsel %vm238_vm1, %v336_v44, %v328_v20 }
  0xb5   :  { %v293_v54 = vsel %vm210_vm2, %v266_v51, %v248_v47  ;;  %v393_v62 = vsel %vm210_vm2, %v366_v16, %v352_v30  ;;  %v441_v38 = vsel %vm439_vm3, %v424_v36, %v432_v3  ;;  %v449_v48 = vsel %vm439_vm3, %v432_v3, %v424_v36 }
  0xb6   :  { %v313_v63 = vsel %vm210_vm2, %v145_v49, %v293_v54  ;;  %v409_v1 = vsel %vm210_vm2, %v193_v61, %v393_v62  ;;  %v495_v41 = vsel %vm213_vm5, %v467_v0, %v449_v48  ;;  %v545_v52 = vsel %vm439_vm3, %v529_v21, %v537_v13 }
  0xb7   :  { %v515_v42 = vsel %vm213_vm5, %v146_v56, %v495_v41  ;;  %v553_v29 = vsel %vm439_vm3, %v537_v13, %v529_v21  ;;  %v642_v2 = vadd.f32 %v626_v26, %v313_v63  ;;  %v643_v3 = vadd.f32 %v627_v46, %v240_v37  ;;  %v108_v37 = vpop.permute.xlu1 %107 }
  0xb8   :  { %v595_v49 = vsel %vm213_vm5, %v567_v15, %v553_v29  ;;  %v690_v44 = vsub.f32 %v545_v52, %v409_v1  ;;  %v132_v61 = vsel %vm42_vm4, %v854_v4, %v104_v59  ;;  %v131_v0 = vsel %vm42_vm4, %v856_v5, %v102_v53 }
  0xb9   :  { %v611_v56 = vsel %vm213_vm5, %v194_v17, %v595_v49  ;;  %v658_v55 = vadd.f32 %v642_v2, %v441_v38  ;;  %v659_v51 = vadd.f32 %v643_v3, %v515_v42  ;;  %v148_v13 = vsub.f32 %v132_v61, %v971_v57 }
  0xba   :  { %v691_v46 = vsub.f32 %v611_v56, %v344_v14  ;;  %v706_v20 = vmul.f32 0.125, %v690_v44  ;;  %v196_v15 = vadd.f32 %v1012_v24, %v132_v61  ;;  %v147_v16 = vsub.f32 %v131_v0, %v976_v58 }
  0xbb   :  { %v674_v36 = vmul.f32 0.125, %v658_v55  ;;  %v675_v21 = vmul.f32 0.125, %v659_v51  ;;  %v232_v4 = vrot.slane %v148_v13, 7  ;;  %v433_v26 = vrot.slane %v148_v13, 1  ;;  %v112_v44 = vpop.permute.xlu1 %111 }
  0xbc   :  { %v707_v47 = vmul.f32 0.125, %v691_v46  ;;  %739 = vst [vmem:[#allocation5 + $0x30] sm:$0xff] %v706_v20  ;;  %v337_v5 = vrot.slane %v196_v15, 7  ;;  %v471_v17 = vrot.slane %v148_v13, %v918_v33  ;;  %v538_v30 = vrot.slane %v196_v15, 1 }
  0xbd   :  { %722 = vst [vmem:[#allocation5 + $0x20] sm:$0xff] %v674_v36  ;;  %723 = vst [vmem:[#allocation5 + $0x28] sm:$0xff] %v675_v21  ;;  %v571_v57 = vrot.slane %v196_v15, %v918_v33  ;;  %v629_v14 = vmul.f32 2.0, %v148_v13  ;;  %v195_v24 = vadd.f32 %v1015_v34, %v131_v0  ;;  %v224_v54 = vrot.slane %v147_v16, 7 }
  0xbe   :  { %740 = vst [vmem:[#allocation5 + $0x38] sm:$0xff] %v707_v47  ;;  %v270_v58 = vrot.slane %v147_v16, %v915_v32  ;;  %v425_v62 = vrot.slane %v147_v16, 1  ;;  %v628_v38 = vmul.f32 2.0, %v147_v16  ;;  %v134_v48 = vsel %vm42_vm4, %v860_v6, %v108_v37  ;;  %v106_v6 = vpop.permute.xlu0 %105 }
  0xbf   :  { %v241_v59 = vsel %vm238_vm1, %v224_v54, %v232_v4  ;;  %v249_v53 = vsel %vm238_vm1, %v232_v4, %v224_v54  ;;  %v329_v63 = vrot.slane %v195_v24, 7  ;;  %v370_v1 = vrot.slane %v195_v24, %v915_v32 }
  0xc0   :  { %v295_v34 = vsel %vm210_vm2, %v270_v58, %v249_v53  ;;  %v442_v41 = vsel %vm439_vm3, %v425_v62, %v433_v26  ;;  %v450_v52 = vsel %vm439_vm3, %v433_v26, %v425_v62  ;;  %v530_v42 = vrot.slane %v195_v24, 1 }
  0xc1   :  { %v315_v29 = vsel %vm210_vm2, %v147_v16, %v295_v34  ;;  %v345_v2 = vsel %vm238_vm1, %v329_v63, %v337_v5  ;;  %v353_v3 = vsel %vm238_vm1, %v337_v5, %v329_v63  ;;  %v497_v49 = vsel %vm213_vm5, %v471_v17, %v450_v52 }
  0xc2   :  { %v395_v61 = vsel %vm210_vm2, %v370_v1, %v353_v3  ;;  %v517_v0 = vsel %vm213_vm5, %v148_v13, %v497_v49  ;;  %v546_v56 = vsel %vm439_vm3, %v530_v42, %v538_v30  ;;  %v554_v55 = vsel %vm439_vm3, %v538_v30, %v530_v42 }
  0xc3   :  { %v411_v51 = vsel %vm210_vm2, %v195_v24, %v395_v61  ;;  %v597_v46 = vsel %vm213_vm5, %v571_v57, %v554_v55  ;;  %v644_v20 = vadd.f32 %v628_v38, %v315_v29  ;;  %v645_v16 = vadd.f32 %v629_v14, %v241_v59 }
  0xc4   :  { %v613_v36 = vsel %vm213_vm5, %v196_v15, %v597_v46  ;;  %v692_v21 = vsub.f32 %v546_v56, %v411_v51  ;;  %v150_v13 = vsub.f32 %v134_v48, %v1000_v18  ;;  %v198_v4 = vadd.f32 %v1038_v25, %v134_v48  ;;  %v110_v15 = vpop.permute.xlu0 %109  ;;  %v116_v25 = vpop.permute.xlu1 %115 }
  0xc5   :  { %v660_v26 = vadd.f32 %v644_v20, %v442_v41  ;;  %v661_v37 = vadd.f32 %v645_v16, %v517_v0  ;;  %v693_v47 = vsub.f32 %v613_v36, %v345_v2  ;;  %v133_v5 = vsel %vm42_vm4, %v862_v7, %v106_v6 }
  0xc6   :  { %v1199_v17 = vadd.f32 %v943_v50, %v932_v45  ;;  %v708_v30 = vmul.f32 0.125, %v692_v21  ;;  %v233_v57 = vrot.slane %v150_v13, 7  ;;  %v338_v14 = vrot.slane %v198_v4, 7 }
  0xc7   :  { %v676_v24 = vmul.f32 0.125, %v660_v26  ;;  %v677_v54 = vmul.f32 0.125, %v661_v37  ;;  %v709_v18 = vmul.f32 0.125, %v693_v47  ;;  %v434_v58 = vrot.slane %v150_v13, 1 }
  0xc8   :  { %741 = vst [vmem:[#allocation5 + $0x50] sm:$0xff] %v708_v30  ;;  %v475_v62 = vrot.slane %v150_v13, %v918_v33  ;;  %v539_v38 = vrot.slane %v198_v4, 1  ;;  %v575_v48 = vrot.slane %v198_v4, %v918_v33  ;;  %v149_v7 = vsub.f32 %v133_v5, %v1005_v19 }
  0xc9   :  { %724 = vst [vmem:[#allocation5 + $0x40] sm:$0xff] %v676_v24  ;;  %725 = vst [vmem:[#allocation5 + $0x48] sm:$0xff] %v677_v54  ;;  %v631_v50 = vmul.f32 2.0, %v150_v13  ;;  %v197_v59 = vadd.f32 %v1041_v39, %v133_v5  ;;  %v136_v53 = vsel %vm42_vm4, %v866_v8, %v112_v44  ;;  %v135_v63 = vsel %vm42_vm4, %v868_v9, %v110_v15  ;;  %v114_v54 = vpop.permute.xlu0 %113 }
  0xca   :  { %742 = vst [vmem:[#allocation5 + $0x58] sm:$0xff] %v709_v18  ;;  %v225_v1 = vrot.slane %v149_v7, 7  ;;  %v274_v34 = vrot.slane %v149_v7, %v915_v32  ;;  %v426_v41 = vrot.slane %v149_v7, 1  ;;  %v138_v19 = vsel %vm42_vm4, %v872_v10, %v116_v25 }
  0xcb   :  { %v330_v52 = vrot.slane %v197_v59, 7  ;;  %v374_v42 = vrot.slane %v197_v59, %v915_v32  ;;  %v531_v39 = vrot.slane %v197_v59, 1  ;;  %v630_v6 = vmul.f32 2.0, %v149_v7 }
  0xcc   :  { %v242_v8 = vsel %vm238_vm1, %v225_v1, %v233_v57  ;;  %v250_v29 = vsel %vm238_vm1, %v233_v57, %v225_v1  ;;  %v451_v9 = vsel %vm439_vm3, %v434_v58, %v426_v41  ;;  %v1223_v2 = vsub.f32 %v136_v53, %v1020_v22 }
  0xcd   :  { %v297_v10 = vsel %vm210_vm2, %v274_v34, %v250_v29  ;;  %v354_v3 = vsel %vm238_vm1, %v338_v14, %v330_v52  ;;  %v443_v49 = vsel %vm439_vm3, %v426_v41, %v434_v58  ;;  %v499_v44 = vsel %vm213_vm5, %v475_v62, %v451_v9 }
  0xce   :  { %v317_v61 = vsel %vm210_vm2, %v149_v7, %v297_v10  ;;  %v397_v0 = vsel %vm210_vm2, %v374_v42, %v354_v3  ;;  %v519_v22 = vsel %vm213_vm5, %v150_v13, %v499_v44  ;;  %v547_v56 = vsel %vm439_vm3, %v531_v39, %v539_v38 }
  0xcf   :  { %v413_v55 = vsel %vm210_vm2, %v197_v59, %v397_v0  ;;  %v555_v51 = vsel %vm439_vm3, %v539_v38, %v531_v39  ;;  %v646_v46 = vadd.f32 %v630_v6, %v317_v61  ;;  %v647_v20 = vadd.f32 %v631_v50, %v242_v8 }
  0xd0   :  { %v346_v16 = vsel %vm238_vm1, %v330_v52, %v338_v14  ;;  %v599_v36 = vsel %vm213_vm5, %v575_v48, %v555_v51  ;;  %v694_v21 = vsub.f32 %v547_v56, %v413_v55  ;;  %v200_v13 = vadd.f32 %v1050_v60, %v136_v53  ;;  %v120_v48 = vpop.permute.xlu1 %119 }
  0xd1   :  { %v615_v26 = vsel %vm213_vm5, %v198_v4, %v599_v36  ;;  %v662_v37 = vadd.f32 %v646_v46, %v443_v49  ;;  %v663_v47 = vadd.f32 %v647_v20, %v519_v22  ;;  %v234_v5 = vrot.slane %v1223_v2, 7 }
  0xd2   :  { %v695_v30 = vsub.f32 %v615_v26, %v346_v16  ;;  %v710_v57 = vmul.f32 0.125, %v694_v21  ;;  %v339_v15 = vrot.slane %v200_v13, 7  ;;  %v435_v24 = vrot.slane %v1223_v2, 1 }
  0xd3   :  { %v678_v14 = vmul.f32 0.125, %v662_v37  ;;  %v679_v18 = vmul.f32 0.125, %v663_v47  ;;  %v479_v58 = vrot.slane %v1223_v2, %v918_v33  ;;  %v540_v25 = vrot.slane %v200_v13, 1 }
  0xd4   :  { %v711_v60 = vmul.f32 0.125, %v695_v30  ;;  %743 = vst [vmem:[#allocation5 + $0x70] sm:$0xff] %v710_v57  ;;  %v579_v4 = vrot.slane %v200_v13, %v918_v33  ;;  %v151_v62 = vsub.f32 %v135_v63, %v1025_v23  ;;  %v199_v38 = vadd.f32 %v1053_v40, %v135_v63  ;;  %v1498_v57 = vld [vmem:[#allocation17_spill] sm:$0xff] }
  0xd5   :  { %726 = vst [vmem:[#allocation5 + $0x60] sm:$0xff] %v678_v14  ;;  %727 = vst [vmem:[#allocation5 + $0x68] sm:$0xff] %v679_v18  ;;  %v633_v7 = vmul.f32 2.0, %v1223_v2  ;;  %v1261_v50 = vsub.f32 %v138_v19, %v1030_v35  ;;  %v1264_v59 = vadd.f32 %v1056_v43, %v138_v19  ;;  %v137_v53 = vsel %vm42_vm4, %v874_v11, %v114_v54  ;;  %v1499_v54 = vld [vmem:[#allocation18_spill] sm:$0xff] }
  0xd6   :  { %744 = vst [vmem:[#allocation5 + $0x78] sm:$0xff] %v711_v60  ;;  %v226_v1 = vrot.slane %v151_v62, 7  ;;  %v278_v23 = vrot.slane %v151_v62, %v915_v32  ;;  %v331_v40 = vrot.slane %v199_v38, 7  ;;  %v378_v63 = vrot.slane %v199_v38, %v915_v32 }
  0xd7   :  { %v427_v34 = vrot.slane %v151_v62, 1  ;;  %v532_v41 = vrot.slane %v199_v38, 1  ;;  %v632_v52 = vmul.f32 2.0, %v151_v62  ;;  %v140_v35 = vsel %vm42_vm4, %v878_v12, %v120_v48 }
  0xd8   :  { %v243_v43 = vsel %vm238_vm1, %v226_v1, %v234_v5  ;;  %v251_v11 = vsel %vm238_vm1, %v234_v5, %v226_v1  ;;  %v355_v19 = vsel %vm238_vm1, %v339_v15, %v331_v40  ;;  %v235_v42 = vrot.slane %v1261_v50, 7 }
  0xd9   :  { %v299_v39 = vsel %vm210_vm2, %v278_v23, %v251_v11  ;;  %v347_v6 = vsel %vm238_vm1, %v331_v40, %v339_v15  ;;  %v399_v12 = vsel %vm210_vm2, %v378_v63, %v355_v19  ;;  %v452_v8 = vsel %vm439_vm3, %v435_v24, %v427_v34 }
  0xda   :  { %v319_v29 = vsel %vm210_vm2, %v151_v62, %v299_v39  ;;  %v415_v9 = vsel %vm210_vm2, %v199_v38, %v399_v12  ;;  %v501_v10 = vsel %vm213_vm5, %v479_v58, %v452_v8  ;;  %v548_v3 = vsel %vm439_vm3, %v532_v41, %v540_v25  ;;  %v1501_v12 = vld [vmem:[#allocation12_spill] sm:$0xff] }
  0xdb   :  { %v521_v49 = vsel %vm213_vm5, %v1223_v2, %v501_v10  ;;  %v556_v44 = vsel %vm439_vm3, %v540_v25, %v532_v41  ;;  %v648_v61 = vadd.f32 %v632_v52, %v319_v29  ;;  %v649_v0 = vadd.f32 %v633_v7, %v243_v43  ;;  %v1502_v29 = vld [vmem:[#allocation14_spill] sm:$0xff] }
  0xdc   :  { %v444_v22 = vsel %vm439_vm3, %v427_v34, %v435_v24  ;;  %v601_v56 = vsel %vm213_vm5, %v579_v4, %v556_v44  ;;  %v696_v55 = vsub.f32 %v548_v3, %v415_v9  ;;  %v340_v51 = vrot.slane %v1264_v59, 7  ;;  %v1503_v9 = vld [vmem:[#allocation13_spill] sm:$0xff] }
  0xdd   :  { %v617_v46 = vsel %vm213_vm5, %v200_v13, %v601_v56  ;;  %v664_v20 = vadd.f32 %v648_v61, %v444_v22  ;;  %v665_v16 = vadd.f32 %v649_v0, %v521_v49  ;;  %v436_v2 = vrot.slane %v1261_v50, 1  ;;  %v118_v49 = vpop.permute.xlu0 %117  ;;  %v124_v56 = vpop.permute.xlu1 %123 }
  0xde   :  { %v697_v36 = vsub.f32 %v617_v46, %v347_v6  ;;  %v712_v21 = vmul.f32 0.125, %v696_v55  ;;  %v483_v26 = vrot.slane %v1261_v50, %v918_v33  ;;  %v541_v37 = vrot.slane %v1264_v59, 1  ;;  %v1500_v6 = vld [vmem:[#allocation11_spill] sm:$0xff] }
  0xdf   :  { %v680_v47 = vmul.f32 0.125, %v664_v20  ;;  %v681_v5 = vmul.f32 0.125, %v665_v16  ;;  %v583_v30 = vrot.slane %v1264_v59, %v918_v33  ;;  %v153_v15 = vsub.f32 %v137_v53, %v1498_v57 }
  0xe0   :  { %v713_v24 = vmul.f32 0.125, %v697_v36  ;;  %745 = vst [vmem:[#allocation5 + $0x90] sm:$0xff] %v712_v21  ;;  %v635_v13 = vmul.f32 2.0, %v1261_v50  ;;  %v201_v14 = vadd.f32 %v1499_v54, %v137_v53  ;;  %v1319_v18 = vsub.f32 %v140_v35, %v932_v45  ;;  %v1504_v21 = vld [vmem:[#allocation8_spill] sm:$0xff] }
  0xe1   :  { %728 = vst [vmem:[#allocation5 + $0x80] sm:$0xff] %v680_v47  ;;  %729 = vst [vmem:[#allocation5 + $0x88] sm:$0xff] %v681_v5  ;;  %v227_v58 = vrot.slane %v153_v15, 7  ;;  %v282_v25 = vrot.slane %v153_v15, %v915_v32  ;;  %v428_v60 = vrot.slane %v153_v15, 1  ;;  %v1323_v4 = vadd.f32 %v1199_v17, %v140_v35  ;;  %v1505_v5 = vld [vmem:[#allocation9_spill] sm:$0xff] }
  0xe2   :  { %746 = vst [vmem:[#allocation5 + $0x98] sm:$0xff] %v713_v24  ;;  %v332_v62 = vrot.slane %v201_v14, 7  ;;  %v382_v38 = vrot.slane %v201_v14, %v915_v32  ;;  %v533_v48 = vrot.slane %v201_v14, 1  ;;  %v634_v7 = vmul.f32 2.0, %v153_v15 }
  0xe3   :  { %v244_v53 = vsel %vm238_vm1, %v227_v58, %v235_v42  ;;  %v252_v45 = vsel %vm238_vm1, %v235_v42, %v227_v58  ;;  %v445_v1 = vsel %vm439_vm3, %v428_v60, %v436_v2  ;;  %v453_v23 = vsel %vm439_vm3, %v436_v2, %v428_v60 }
  0xe4   :  { %v301_v17 = vsel %vm210_vm2, %v282_v25, %v252_v45  ;;  %v348_v40 = vsel %vm238_vm1, %v332_v62, %v340_v51  ;;  %v356_v63 = vsel %vm238_vm1, %v340_v51, %v332_v62  ;;  %v503_v34 = vsel %vm213_vm5, %v483_v26, %v453_v23 }
  0xe5   :  { %v321_v41 = vsel %vm210_vm2, %v153_v15, %v301_v17  ;;  %v401_v52 = vsel %vm210_vm2, %v382_v38, %v356_v63  ;;  %v523_v35 = vsel %vm213_vm5, %v1261_v50, %v503_v34  ;;  %v549_v43 = vsel %vm439_vm3, %v533_v48, %v541_v37  ;;  %v122_v34 = vpop.permute.xlu0 %121 }
  0xe6   :  { %v417_v11 = vsel %vm210_vm2, %v201_v14, %v401_v52  ;;  %v557_v19 = vsel %vm439_vm3, %v541_v37, %v533_v48  ;;  %v650_v42 = vadd.f32 %v634_v7, %v321_v41  ;;  %v651_v39 = vadd.f32 %v635_v13, %v244_v53 }
  0xe7   :  { %v187_v8 = vadd.f32 %v1501_v12, %v1500_v6  ;;  %v190_v10 = vadd.f32 %v1503_v9, %v1502_v29  ;;  %v603_v50 = vsel %vm213_vm5, %v583_v30, %v557_v19  ;;  %v698_v3 = vsub.f32 %v549_v43, %v417_v11  ;;  %v1507_v12 = vld [vmem:[#allocation15_spill] sm:$0xff] }
  0xe8   :  { %v619_v44 = vsel %vm213_vm5, %v1264_v59, %v603_v50  ;;  %v666_v61 = vadd.f32 %v650_v42, %v445_v1  ;;  %v667_v0 = vadd.f32 %v651_v39, %v523_v35  ;;  %v236_v22 = vrot.slane %v1319_v18, 7 }
  0xe9   :  { %v699_v55 = vsub.f32 %v619_v44, %v348_v40  ;;  %v714_v51 = vmul.f32 0.125, %v698_v3  ;;  %v341_v46 = vrot.slane %v1323_v4, 7  ;;  %v437_v20 = vrot.slane %v1319_v18, 1 }
  0xea   :  { %v682_v16 = vmul.f32 0.125, %v666_v61  ;;  %v683_v2 = vmul.f32 0.125, %v667_v0  ;;  %v487_v36 = vrot.slane %v1319_v18, %v918_v33  ;;  %v139_v59 = vsel %vm42_vm4, %v1504_v21, %v118_v49 }
  0xeb   :  { %v715_v26 = vmul.f32 0.125, %v699_v55  ;;  %747 = vst [vmem:[#allocation5 + $0xb0] sm:$0xff] %v714_v51  ;;  %v155_v37 = vsub.f32 %v139_v59, %v1500_v6  ;;  %v203_v47 = vadd.f32 %v187_v8, %v139_v59  ;;  %v142_v30 = vsel %vm42_vm4, %v1505_v5, %v124_v56  ;;  %v1506_v6 = vld [vmem:[#allocation16_spill] sm:$0xff] }
  0xec   :  { %730 = vst [vmem:[#allocation5 + $0xa0] sm:$0xff] %v682_v16  ;;  %731 = vst [vmem:[#allocation5 + $0xa8] sm:$0xff] %v683_v2  ;;  %v542_v57 = vrot.slane %v1323_v4, 1  ;;  %v587_v15 = vrot.slane %v1323_v4, %v918_v33  ;;  %v637_v24 = vmul.f32 2.0, %v1319_v18  ;;  %v1381_v13 = vsub.f32 %v142_v30, %v1502_v29 }
  0xed   :  { %748 = vst [vmem:[#allocation5 + $0xb8] sm:$0xff] %v715_v26  ;;  %v228_v54 = vrot.slane %v155_v37, 7  ;;  %v286_v14 = vrot.slane %v155_v37, %v915_v32  ;;  %v333_v58 = vrot.slane %v203_v47, 7  ;;  %v386_v25 = vrot.slane %v203_v47, %v915_v32 }
  0xee   :  { %v429_v60 = vrot.slane %v155_v37, 1  ;;  %v534_v62 = vrot.slane %v203_v47, 1  ;;  %v636_v38 = vmul.f32 2.0, %v155_v37  ;;  %v1385_v48 = vadd.f32 %v190_v10, %v142_v30  ;;  %v1508_v10 = vld [vmem:[#allocation10_spill] sm:$0xff] }
  0xef   :  { %v245_v7 = vsel %vm238_vm1, %v228_v54, %v236_v22  ;;  %v253_v53 = vsel %vm238_vm1, %v236_v22, %v228_v54  ;;  %v349_v45 = vsel %vm238_vm1, %v333_v58, %v341_v46  ;;  %v357_v1 = vsel %vm238_vm1, %v341_v46, %v333_v58 }
  0xf0   :  { %v303_v23 = vsel %vm210_vm2, %v286_v14, %v253_v53  ;;  %v403_v17 = vsel %vm210_vm2, %v386_v25, %v357_v1  ;;  %v446_v40 = vsel %vm439_vm3, %v429_v60, %v437_v20  ;;  %v454_v63 = vsel %vm439_vm3, %v437_v20, %v429_v60 }
  0xf1   :  { %v323_v41 = vsel %vm210_vm2, %v155_v37, %v303_v23  ;;  %v419_v52 = vsel %vm210_vm2, %v203_v47, %v403_v17  ;;  %v505_v35 = vsel %vm213_vm5, %v487_v36, %v454_v63  ;;  %v550_v43 = vsel %vm439_vm3, %v534_v62, %v542_v57 }
  0xf2   :  { %v525_v11 = vsel %vm213_vm5, %v1319_v18, %v505_v35  ;;  %v558_v19 = vsel %vm439_vm3, %v542_v57, %v534_v62  ;;  %v652_v42 = vadd.f32 %v636_v38, %v323_v41  ;;  %v653_v39 = vadd.f32 %v637_v24, %v245_v7 }
  0xf3   :  { %v189_v8 = vadd.f32 %v1507_v12, %v1506_v6  ;;  %v605_v29 = vsel %vm213_vm5, %v587_v15, %v558_v19  ;;  %v700_v9 = vsub.f32 %v550_v43, %v419_v52  ;;  %v141_v50 = vsel %vm42_vm4, %v1508_v10, %v122_v34 }
  0xf4   :  { %v621_v18 = vsel %vm213_vm5, %v1323_v4, %v605_v29  ;;  %v668_v3 = vadd.f32 %v652_v42, %v446_v40  ;;  %v669_v49 = vadd.f32 %v653_v39, %v525_v11  ;;  %v237_v44 = vrot.slane %v1381_v13, 7 }
  0xf5   :  { %v701_v61 = vsub.f32 %v621_v18, %v349_v45  ;;  %v716_v0 = vmul.f32 0.125, %v700_v9  ;;  %v342_v22 = vrot.slane %v1385_v48, 7  ;;  %v438_v56 = vrot.slane %v1381_v13, 1 }
  0xf6   :  { %v684_v55 = vmul.f32 0.125, %v668_v3  ;;  %v685_v51 = vmul.f32 0.125, %v669_v49  ;;  %v491_v27 = vrot.slane %v1381_v13, %v918_v33  ;;  %v157_v46 = vsub.f32 %v141_v50, %v1506_v6 }
  0xf7   :  { %v717_v20 = vmul.f32 0.125, %v701_v61  ;;  %749 = vst [vmem:[#allocation5 + $0xd0] sm:$0xff] %v716_v0  ;;  %v543_v4 = vrot.slane %v1385_v48, 1  ;;  %v591_v16 = vrot.slane %v1385_v48, %v918_v33  ;;  %v205_v2 = vadd.f32 %v189_v8, %v141_v50 }
  0xf8   :  { %732 = vst [vmem:[#allocation5 + $0xc0] sm:$0xff] %v684_v55  ;;  %733 = vst [vmem:[#allocation5 + $0xc8] sm:$0xff] %v685_v51  ;;  %v639_v36 = vmul.f32 2.0, %v1381_v13  ;;  %v229_v21 = vrot.slane %v157_v46, 7  ;;  %v290_v59 = vrot.slane %v157_v46, %v915_v32  ;;  %v430_v26 = vrot.slane %v157_v46, 1 }
  0xf9   :  { %750 = vst [vmem:[#allocation5 + $0xd8] sm:$0xff] %v717_v20  ;;  %v334_v37 = vrot.slane %v205_v2, 7  ;;  %v390_v47 = vrot.slane %v205_v2, %v915_v32  ;;  %v535_v5 = vrot.slane %v205_v2, 1  ;;  %v638_v30 = vmul.f32 2.0, %v157_v46 }
  0xfa   :  { %v246_v57 = vsel %vm238_vm1, %v229_v21, %v237_v44  ;;  %v254_v33 = vsel %vm238_vm1, %v237_v44, %v229_v21  ;;  %v447_v15 = vsel %vm439_vm3, %v430_v26, %v438_v56  ;;  %v455_v24 = vsel %vm439_vm3, %v438_v56, %v430_v26 }
  0xfb   :  { %v305_v54 = vsel %vm210_vm2, %v290_v59, %v254_v33  ;;  %v350_v32 = vsel %vm238_vm1, %v334_v37, %v342_v22  ;;  %v358_v14 = vsel %vm238_vm1, %v342_v22, %v334_v37  ;;  %v507_v58 = vsel %vm213_vm5, %v491_v27, %v455_v24 }
  0xfc   :  { %v325_v25 = vsel %vm210_vm2, %v157_v46, %v305_v54  ;;  %v405_v60 = vsel %vm210_vm2, %v390_v47, %v358_v14  ;;  %v527_v62 = vsel %vm213_vm5, %v1381_v13, %v507_v58  ;;  %v551_v38 = vsel %vm439_vm3, %v535_v5, %v543_v4 }
  0xfd   :  { %v421_v7 = vsel %vm210_vm2, %v205_v2, %v405_v60  ;;  %v559_v53 = vsel %vm439_vm3, %v543_v4, %v535_v5  ;;  %v654_v45 = vadd.f32 %v638_v30, %v325_v25  ;;  %v655_v1 = vadd.f32 %v639_v36, %v246_v57 }
  0xfe   :  { %v607_v23 = vsel %vm213_vm5, %v591_v16, %v559_v53  ;;  %v702_v17 = vsub.f32 %v551_v38, %v421_v7 }
  0xff   :  { %v623_v40 = vsel %vm213_vm5, %v1385_v48, %v607_v23  ;;  %v670_v13 = vadd.f32 %v654_v45, %v447_v15  ;;  %v671_v63 = vadd.f32 %v655_v1, %v527_v62 }
 0x100   :  { %v703_v34 = vsub.f32 %v623_v40, %v350_v32  ;;  %v718_v41 = vmul.f32 0.125, %v702_v17 }
 0x101   :  { %v686_v52 = vmul.f32 0.125, %v670_v13  ;;  %v687_v35 = vmul.f32 0.125, %v671_v63 }
 0x102   :  { %v719_v28 = vmul.f32 0.125, %v703_v34  ;;  %751 = vst [vmem:[#allocation5 + $0xf0] sm:$0xff] %v718_v41 }
 0x103   :  { %734 = vst [vmem:[#allocation5 + $0xe0] sm:$0xff] %v686_v52  ;;  %735 = vst [vmem:[#allocation5 + $0xe8] sm:$0xff] %v687_v35 }
 0x104   :  { %752 = vst [vmem:[#allocation5 + $0xf8] sm:$0xff] %v719_v28 }
 0x105   :  { %807 = shalt.err (!%p804_p9)
}
 0x106   :  { %764 = dma.vmem_to_hbm [thread:$0]  %s759_s15, 4096, %s1479_s1, [#allocation4], %s821_s9, %s821_s9, %s822_s10  }
 0x107   :  { %818 = dma.done.wait [#allocation4], 4096  }
 0x108   :  { %819 = vsyncadd [#allocation4], 4294963200 }
 0x109   :  { %768 = vsyncpa [#allocation3], 1 }
 0x10a   :  { %769 = vsyncpa [#allocation4], 1 }

</bundles_post_ra>
